<compile_context>
chip_gen: v7x
topology: tpu7x:2x2x1
jax: 0.10.0
libtpu: 0.0.40
codegen_flags: <defaults>
</compile_context>

<pallas_src>
import functools

import jax
import jax.numpy as jnp
from jax.experimental import pallas as pl
from jax.experimental.pallas import tpu as pltpu


def _round_up(x, m):
    return ((x + m - 1) // m) * m


def _device_kind():
    try:
        return jax.devices()[0].device_kind.lower()
    except Exception:
        return ""


def _generation_config():
    kind = _device_kind()
    is_v5 = "v5" in kind
    is_v7 = "v7" in kind
    return dict(
        gelu_bf16=not is_v5,                       # v6e/v7x have bf16 VPU/EUP
        target_tile_rows=1024 if is_v7 else 2048,  # bigger tiles on 128 MiB VMEM
        vmem_cap_bytes=(56 << 20) if is_v7 else (100 << 20),
        prefer_two_tiles=is_v7,                    # feed both v7x TensorCores
    )


def _pick_bpt(b8, num_patches, target_rows, prefer_two_tiles):
    """Batches-per-tile: multiple of 8 dividing b8 (no batch-padding waste)."""
    divisors = [d for d in range(8, b8 + 1, 8) if b8 % d == 0]
    want = max(8, target_rows // max(num_patches, 1))
    cands = [d for d in divisors if d <= want]
    bpt = max(cands) if cands else min(divisors)
    if prefer_two_tiles:
        two = [d for d in divisors if b8 // d >= 2 and d <= bpt]
        if two:
            bpt = max(two)
    return bpt


# ---------------------------------------------------------------------------
# Pallas kernel: fused  patches @ W1 + b1 -> GELU -> pool (bf16 MXU dot)
#                -> pooled @ W2 + b2  == logits      (one row tile per step)
# ---------------------------------------------------------------------------
def _classifier_kernel(patches_ref, w1_ref, b1_ref, w2_ref, b2_ref, pool_ref,
                       logits_ref, *, gelu_bf16, inv_num_patches):
    # patches: (TR, Dp_pad) bf16   w1: (Dp_pad, H_pad) bf16   b1: (1, H_pad) f32
    # pool:    (BPT, TR)   bf16 0/1   w2: (H_pad, NC_pad) bf16
    # b2:      (1, NC_pad) f32        logits: (BPT, NC_pad) f32

    # Patch embedding (stride-P conv) on the MXU, bf16 in / f32 accumulate.
    h = jnp.dot(patches_ref[...], w1_ref[...],
                preferred_element_type=jnp.float32)
    h = h + b1_ref[...]

    if gelu_bf16:
        # v6e/v7x: bf16 VPU/EUP -> tanh-GELU packs 2 elems/lane; halves the
        # live (TR, H_pad) intermediate as well.
        h = jax.nn.gelu(h.astype(jnp.bfloat16), approximate=True)
    else:
        # v5e has no bf16 VALU/EUP: keep GELU in f32, cast for the pool matmul.
        h = jax.nn.gelu(h, approximate=True).astype(jnp.bfloat16)

    # Sum-pool over the patch axis as a bf16 MXU matmul against a constant
    # 0/1 block-diagonal matrix; exact mean scale applied in f32 after.
    pooled = jnp.dot(pool_ref[...], h, preferred_element_type=jnp.float32)
    pooled = pooled * inv_num_patches

    # Classification head: bf16 MXU, f32 accumulation, f32 bias add.
    logits = jnp.dot(pooled.astype(jnp.bfloat16), w2_ref[...],
                     preferred_element_type=jnp.float32)
    logits_ref[...] = (logits + b2_ref[...]).astype(logits_ref.dtype)


def _make_params(key, in_ch, patch, hidden, num_classes, dtype=jnp.float32):
    k1, k2, k3, k4 = jax.random.split(key, 4)
    dp = in_ch * patch * patch
    w1 = jax.random.normal(k1, (dp, hidden), dtype) * 0.02
    b1 = jax.random.normal(k2, (1, hidden), dtype) * 0.01
    w2 = jax.random.normal(k3, (hidden, num_classes), dtype) * 0.02
    b2 = jax.random.normal(k4, (1, num_classes), dtype) * 0.01
    return w1, b1, w2, b2


@functools.partial(
    jax.jit,
    static_argnames=("patch", "gelu_bf16", "target_tile_rows",
                     "vmem_cap_bytes", "prefer_two_tiles"))
def _forward_impl(x, params, *, patch, gelu_bf16, target_tile_rows,
                  vmem_cap_bytes, prefer_two_tiles):
    w1, b1, w2, b2 = params
    B, C, H, W = x.shape
    assert H % patch == 0 and W % patch == 0
    ph, pw = H // patch, W // patch
    num_patches = ph * pw
    hidden = w1.shape[-1]
    num_classes = w2.shape[-1]

    dp = C * patch * patch
    dp_pad = _round_up(dp, 128)
    h_pad = _round_up(hidden, 128)
    nc_pad = _round_up(num_classes, 128)

    b8 = _round_up(B, 8)
    bpt = _pick_bpt(b8, num_patches, target_tile_rows, prefer_two_tiles)
    num_tiles = b8 // bpt
    tile_rows = bpt * num_patches

    # --- Glue: non-overlapping patch extraction, entirely in bf16 (cast
    # first, then reshape/transpose/pad) so the patch slab crosses HBM once
    # at half width. Pure layout work, no FLOPs.
    # TODO(synk): fuse the NCHW patch extraction into the kernel via
    # (1, C, P, P)-style BlockSpec windows so the slab is never materialized.
    x_bf = x.astype(jnp.bfloat16)
    xp = x_bf.reshape(B, C, ph, patch, pw, patch)
    xp = jnp.transpose(xp, (0, 2, 4, 1, 3, 5))            # B, ph, pw, C, p, p
    patches = xp.reshape(B * num_patches, dp)
    pad_rows = b8 * num_patches - B * num_patches
    patches_p = jnp.pad(patches, ((0, pad_rows), (0, dp_pad - dp)))

    w1_p = jnp.pad(w1, ((0, dp_pad - dp), (0, h_pad - hidden))).astype(jnp.bfloat16)
    b1_p = jnp.pad(b1, ((0, 0), (0, h_pad - hidden)))                     # f32
    w2_p = jnp.pad(w2, ((0, h_pad - hidden),
                        (0, nc_pad - num_classes))).astype(jnp.bfloat16)
    b2_p = jnp.pad(b2, ((0, 0), (0, nc_pad - num_classes)))               # f32

    # Constant 0/1 block-diagonal pooling matrix (bf16): pool[b, r] = 1 iff
    # r // num_patches == b. Mean scale (1/Np) is applied in-kernel in f32.
    row_batch = jnp.arange(tile_rows) // num_patches
    pool = (row_batch[None, :] == jnp.arange(bpt)[:, None]).astype(jnp.bfloat16)

    # --- Exact VMEM accounting: 2x streamed patch tiles, 1x single-buffered
    # weights/pool, 2x output, plus intermediate estimate and fixed headroom.
    needed = (
        2 * tile_rows * dp_pad * 2                      # patches bf16, 2 bufs
        + dp_pad * h_pad * 2 + 8 * h_pad * 4            # w1 bf16 + b1 f32 (1 buf)
        + h_pad * nc_pad * 2 + 8 * nc_pad * 4           # w2 bf16 + b2 f32 (1 buf)
        + _round_up(bpt, 16) * tile_rows * 2            # pool bf16 (1 buf)
        + 2 * bpt * nc_pad * 4                          # output f32, 2 bufs
        + tile_rows * h_pad * 6                         # h intermediates (f32+bf16)
    )
    vmem_limit = int(min(vmem_cap_bytes, needed + (8 << 20)))

    kernel = functools.partial(_classifier_kernel, gelu_bf16=gelu_bf16,
                               inv_num_patches=1.0 / num_patches)

    grid_spec = pltpu.PrefetchScalarGridSpec(
        num_scalar_prefetch=0,
        grid=(num_tiles,),
        in_specs=[
            # Streamed operand: default double-buffered.
            pl.BlockSpec((tile_rows, dp_pad), lambda i: (i, 0)),
            # Grid-invariant operands: single-buffered (halve weight VMEM).
            pl.BlockSpec((dp_pad, h_pad), lambda i: (0, 0),
                         pipeline_mode=pl.Buffered(1)),
            pl.BlockSpec((1, h_pad), lambda i: (0, 0),
                         pipeline_mode=pl.Buffered(1)),
            pl.BlockSpec((h_pad, nc_pad), lambda i: (0, 0),
                         pipeline_mode=pl.Buffered(1)),
            pl.BlockSpec((1, nc_pad), lambda i: (0, 0),
                         pipeline_mode=pl.Buffered(1)),
            pl.BlockSpec((bpt, tile_rows), lambda i: (0, 0),
                         pipeline_mode=pl.Buffered(1)),
        ],
        out_specs=pl.BlockSpec((bpt, nc_pad), lambda i: (i, 0)),
    )

    logits_full = pl.pallas_call(
        kernel,
        out_shape=jax.ShapeDtypeStruct((b8, nc_pad), jnp.float32),
        grid_spec=grid_spec,
        compiler_params=pltpu.CompilerParams(
            dimension_semantics=("parallel",),   # row tiles shard across TCs
            vmem_limit_bytes=vmem_limit,
        ),
    )(patches_p, w1_p, b1_p, w2_p, b2_p, pool)

    return logits_full[:B, :num_classes]


def huggingface_to_tensor_forward(x, params, *, patch):
    """Equivalent of HuggingfaceToTensorModelWrapper(model)(x) -> logits.

    x: [B, C, H, W]  (NCHW, matching the PyTorch convention).
    Returns logits: [B, num_classes] float32.
    """
    cfg = _generation_config()
    return _forward_impl(x, params, patch=patch, **cfg)


def _reference_forward(x, params, *, patch, gelu_bf16):
    """Pure-JAX reference matching the kernel's bf16 quantization points."""
    w1, b1, w2, b2 = params
    B, C, H, W = x.shape
    ph, pw = H // patch, W // patch
    xp = x.astype(jnp.bfloat16)
    xp = xp.reshape(B, C, ph, patch, pw, patch)
    xp = jnp.transpose(xp, (0, 2, 4, 1, 3, 5)).reshape(B, ph * pw, -1)
    xp = xp.astype(jnp.float32)
    w1q = w1.astype(jnp.bfloat16).astype(jnp.float32)
    h = jnp.einsum("bpd,dh->bph", xp, w1q) + b1[0]
    if gelu_bf16:
        h = jax.nn.gelu(h.astype(jnp.bfloat16), approximate=True)
    else:
        h = jax.nn.gelu(h, approximate=True).astype(jnp.bfloat16)
    pooled = jnp.mean(h.astype(jnp.float32), axis=1)
    pooled = pooled.astype(jnp.bfloat16).astype(jnp.float32)
    w2q = w2.astype(jnp.bfloat16).astype(jnp.float32)
    return pooled @ w2q + b2[0]


if __name__ == "__main__":
    # Small shapes consistent with an NCHW image-classification model.
    B, C, H, W = 2, 4, 16, 16
    PATCH = 4
    HIDDEN = 32
    NUM_CLASSES = 10

    key = jax.random.PRNGKey(0)
    kx, kp = jax.random.split(key)
    x = jax.random.normal(kx, (B, C, H, W), jnp.float32)
    params = _make_params(kp, C, PATCH, HIDDEN, NUM_CLASSES)

    logits = huggingface_to_tensor_forward(x, params, patch=PATCH)
    logits = jax.block_until_ready(logits)

    cfg = _generation_config()
    ref = _reference_forward(x, params, patch=PATCH, gelu_bf16=cfg["gelu_bf16"])
    assert logits.shape == (B, NUM_CLASSES)
    assert jnp.allclose(logits, ref, atol=2e-3, rtol=2e-2), (
        jnp.max(jnp.abs(logits - ref)))

    print("KERNEL_OK")
</pallas_src>

<mosaic_0001>
module attributes {stable_mosaic.version = 11 : i64} {
  func.func @_classifier_kernel(%arg0: i32, %arg1: memref<128x128xbf16, #tpu.memory_space<vmem>>, %arg2: memref<128x128xbf16, #tpu.memory_space<vmem>>, %arg3: memref<1x128xf32, #tpu.memory_space<vmem>>, %arg4: memref<128x128xbf16, #tpu.memory_space<vmem>>, %arg5: memref<1x128xf32, #tpu.memory_space<vmem>>, %arg6: memref<8x128xbf16, #tpu.memory_space<vmem>>, %arg7: memref<8x128xf32, #tpu.memory_space<vmem>>) attributes {dimension_semantics = [#tpu.dimension_semantics<parallel>], iteration_bounds = array<i64: 1>, scalar_prefetch = 0 : i64, scratch_operands = 0 : i64, tpu.core_type = #tpu.core_type<tc>, window_params = [{transform_indices = @transform_0, window_bounds = array<i64: 128, 128>}, {pipeline_mode = #tpu.pipeline_mode<synchronous>, transform_indices = @transform_1, window_bounds = array<i64: 128, 128>}, {pipeline_mode = #tpu.pipeline_mode<synchronous>, transform_indices = @transform_2, window_bounds = array<i64: 1, 128>}, {pipeline_mode = #tpu.pipeline_mode<synchronous>, transform_indices = @transform_3, window_bounds = array<i64: 128, 128>}, {pipeline_mode = #tpu.pipeline_mode<synchronous>, transform_indices = @transform_4, window_bounds = array<i64: 1, 128>}, {pipeline_mode = #tpu.pipeline_mode<synchronous>, transform_indices = @transform_5, window_bounds = array<i64: 8, 128>}, {transform_indices = @transform_6, window_bounds = array<i64: 8, 128>}]} {
    %c0 = arith.constant 0 : index
    %c0_0 = arith.constant 0 : index
    %0 = vector.load %arg1[%c0, %c0_0] : memref<128x128xbf16, #tpu.memory_space<vmem>>, vector<128x128xbf16>
    %c0_1 = arith.constant 0 : index
    %c0_2 = arith.constant 0 : index
    %1 = vector.load %arg2[%c0_1, %c0_2] : memref<128x128xbf16, #tpu.memory_space<vmem>>, vector<128x128xbf16>
    %cst = arith.constant dense<0.000000e+00> : vector<128x128xf32>
    %2 = tpu.matmul %0, %1, %cst {dimension_numbers = #tpu.dot_dimension_numbers<[1], [0], [0], [1], [0, 0, 1, 1], [], []>} : vector<128x128xbf16>, vector<128x128xbf16>, vector<128x128xf32> -> vector<128x128xf32>
    %c0_3 = arith.constant 0 : index
    %c0_4 = arith.constant 0 : index
    %3 = vector.load %arg3[%c0_3, %c0_4] : memref<1x128xf32, #tpu.memory_space<vmem>>, vector<1x128xf32>
    %4 = vector.broadcast %3 : vector<1x128xf32> to vector<128x128xf32>
    %5 = arith.addf %2, %4 : vector<128x128xf32>
    %6 = arith.truncf %5 : vector<128x128xf32> to vector<128x128xbf16>
    %7 = arith.mulf %6, %6 : vector<128x128xbf16>
    %8 = arith.mulf %6, %7 : vector<128x128xbf16>
    %cst_5 = arith.constant 4.467770e-02 : bf16
    %9 = vector.broadcast %cst_5 : bf16 to vector<128x128xbf16>
    %10 = arith.mulf %9, %8 : vector<128x128xbf16>
    %11 = arith.addf %6, %10 : vector<128x128xbf16>
    %cst_6 = arith.constant 7.968750e-01 : bf16
    %12 = vector.broadcast %cst_6 : bf16 to vector<128x128xbf16>
    %13 = arith.mulf %12, %11 : vector<128x128xbf16>
    %14 = math.tanh %13 : vector<128x128xbf16>
    %cst_7 = arith.constant 1.000000e+00 : bf16
    %15 = vector.broadcast %cst_7 : bf16 to vector<128x128xbf16>
    %16 = arith.addf %15, %14 : vector<128x128xbf16>
    %cst_8 = arith.constant 5.000000e-01 : bf16
    %17 = vector.broadcast %cst_8 : bf16 to vector<128x128xbf16>
    %18 = arith.mulf %17, %16 : vector<128x128xbf16>
    %19 = arith.mulf %6, %18 : vector<128x128xbf16>
    %c0_9 = arith.constant 0 : index
    %c0_10 = arith.constant 0 : index
    %20 = vector.load %arg6[%c0_9, %c0_10] : memref<8x128xbf16, #tpu.memory_space<vmem>>, vector<8x128xbf16>
    %cst_11 = arith.constant dense<0.000000e+00> : vector<8x128xf32>
    %21 = tpu.matmul %20, %19, %cst_11 {dimension_numbers = #tpu.dot_dimension_numbers<[1], [0], [0], [1], [0, 0, 1, 1], [], []>} : vector<8x128xbf16>, vector<128x128xbf16>, vector<8x128xf32> -> vector<8x128xf32>
    %cst_12 = arith.constant 6.250000e-02 : f32
    %22 = vector.broadcast %cst_12 : f32 to vector<8x128xf32>
    %23 = arith.mulf %21, %22 : vector<8x128xf32>
    %24 = arith.truncf %23 : vector<8x128xf32> to vector<8x128xbf16>
    %c0_13 = arith.constant 0 : index
    %c0_14 = arith.constant 0 : index
    %25 = vector.load %arg4[%c0_13, %c0_14] : memref<128x128xbf16, #tpu.memory_space<vmem>>, vector<128x128xbf16>
    %cst_15 = arith.constant dense<0.000000e+00> : vector<8x128xf32>
    %26 = tpu.matmul %24, %25, %cst_15 {dimension_numbers = #tpu.dot_dimension_numbers<[1], [0], [0], [1], [0, 0, 1, 1], [], []>} : vector<8x128xbf16>, vector<128x128xbf16>, vector<8x128xf32> -> vector<8x128xf32>
    %c0_16 = arith.constant 0 : index
    %c0_17 = arith.constant 0 : index
    %27 = vector.load %arg5[%c0_16, %c0_17] : memref<1x128xf32, #tpu.memory_space<vmem>>, vector<1x128xf32>
    %28 = vector.broadcast %27 : vector<1x128xf32> to vector<8x128xf32>
    %29 = arith.addf %26, %28 : vector<8x128xf32>
    %c0_18 = arith.constant 0 : index
    %c0_19 = arith.constant 0 : index
    %30 = vector.load %arg7[%c0_18, %c0_19] : memref<8x128xf32, #tpu.memory_space<vmem>>, vector<8x128xf32>
    tpu.vector_store %arg7[%c0_18, %c0_19], %29 {strides = array<i32>} : memref<8x128xf32, #tpu.memory_space<vmem>>, vector<8x128xf32>,
    return
  }
  func.func @transform_0(%arg0: i32) -> (i32, i32) {
    %c0_i32 = arith.constant 0 : i32
    %c0_i32_0 = arith.constant 0 : i32
    return %arg0, %c0_i32 : i32, i32
  }
  func.func @transform_1(%arg0: i32) -> (i32, i32) {
    %c0_i32 = arith.constant 0 : i32
    %c0_i32_0 = arith.constant 0 : i32
    %c0_i32_1 = arith.constant 0 : i32
    return %c0_i32, %c0_i32_0 : i32, i32
  }
  func.func @transform_2(%arg0: i32) -> (i32, i32) {
    %c0_i32 = arith.constant 0 : i32
    %c0_i32_0 = arith.constant 0 : i32
    %c0_i32_1 = arith.constant 0 : i32
    return %c0_i32, %c0_i32_0 : i32, i32
  }
  func.func @transform_3(%arg0: i32) -> (i32, i32) {
    %c0_i32 = arith.constant 0 : i32
    %c0_i32_0 = arith.constant 0 : i32
    %c0_i32_1 = arith.constant 0 : i32
    return %c0_i32, %c0_i32_0 : i32, i32
  }
  func.func @transform_4(%arg0: i32) -> (i32, i32) {
    %c0_i32 = arith.constant 0 : i32
    %c0_i32_0 = arith.constant 0 : i32
    %c0_i32_1 = arith.constant 0 : i32
    return %c0_i32, %c0_i32_0 : i32, i32
  }
  func.func @transform_5(%arg0: i32) -> (i32, i32) {
    %c0_i32 = arith.constant 0 : i32
    %c0_i32_0 = arith.constant 0 : i32
    %c0_i32_1 = arith.constant 0 : i32
    return %c0_i32, %c0_i32_0 : i32, i32
  }
  func.func @transform_6(%arg0: i32) -> (i32, i32) {
    %c0_i32 = arith.constant 0 : i32
    %c0_i32_0 = arith.constant 0 : i32
    return %arg0, %c0_i32 : i32, i32
  }
}

</mosaic_0001>

<bundles_post_ra>
// kernel: _forward_impl.1
= control target key start
LH: loop header
LB: loop body
LE: loop exit
PB: predicated region body
PF: predicated region fallthrough
CT: control target
= control target key end

     0   :  { %v673_v16 = vmov 0.0   ;;  %vm674_vm0 = vmmov 0   ;;  %s879_s1 = inlined_call_operand.vmem [shape: bf16[128,128], index: 1, kind: input, shape index: {}]   ;;  %s880_s0 = inlined_call_operand.vmem [shape: bf16[128,128], index: 0, kind: input, shape index: {}]   ;;  %s881_s3 = inlined_call_operand.vmem [shape: bf16[128,128], index: 3, kind: input, shape index: {}]   ;;  %s882_s2 = inlined_call_operand.vmem [shape: f32[1,128], index: 2, kind: input, shape index: {}]   ;;  %s883_s5 = inlined_call_operand.vmem [shape: bf16[8,128], index: 5, kind: input, shape index: {}]   ;;  %s884_s4 = inlined_call_operand.vmem [shape: f32[1,128], index: 4, kind: input, shape index: {}]   ;;  %s885_s6 = inlined_call_operand.vmem [shape: f32[8,128], index: 6, kind: output, shape index: {}]  }
   0x1   :  { %v633_v0 = vld [vmem:[%s879_s1] sm:$0xff]   ;;  %v634_v1 = vld [vmem:[%s879_s1 + $0x8] sm:$0xff]   ;;  %v635_v2 = vld [vmem:[%s879_s1 + $0x10] sm:$0xff]   ;;  %591 = vmatprep.subr.bf16.mxu1 %v673_v16  ;;  %607 = vmatprep.mubr.msk.bf16.mxu1 %vm674_vm0, %v673_v16 }
   0x2   :  { %559 = vmatprep.subr.bf16.mxu0 %v633_v0  ;;  %v636_v3 = vld [vmem:[%s879_s1 + $0x18] sm:$0xff]   ;;  %v641_v4 = vld [vmem:[%s880_s0] sm:$0xff]   ;;  %v638_v6 = vld [vmem:[%s879_s1 + $0x28] sm:$0xff]  }
   0x3   :  { %560 = vmatpush3.bf16.msra.mxu0 %v633_v0  ;;  %575 = vmatprep.mubr.bf16.mxu0 %v641_v4  ;;  %v637_v5 = vld [vmem:[%s879_s1 + $0x20] sm:$0xff]   ;;  %v639_v7 = vld [vmem:[%s879_s1 + $0x30] sm:$0xff]   ;;  %v640_v8 = vld [vmem:[%s879_s1 + $0x38] sm:$0xff]  }
   0x4   :  { %561 = vmatprep.subr.bf16.mxu0 %v634_v1  ;;  %v642_v9 = vld [vmem:[%s880_s0 + $0x8] sm:$0xff]   ;;  %v643_v10 = vld [vmem:[%s880_s0 + $0x10] sm:$0xff]   ;;  %v644_v11 = vld [vmem:[%s880_s0 + $0x18] sm:$0xff]  }
   0x5   :  { %v645_v12 = vld [vmem:[%s880_s0 + $0x20] sm:$0xff]   ;;  %v646_v13 = vld [vmem:[%s880_s0 + $0x28] sm:$0xff]   ;;  %v647_v14 = vld [vmem:[%s880_s0 + $0x30] sm:$0xff]  }
   0x6   :  { %v648_v15 = vld [vmem:[%s880_s0 + $0x38] sm:$0xff]   ;;  %v649_v17 = vld [vmem:[%s881_s3] sm:$0xff]   ;;  %v650_v18 = vld [vmem:[%s881_s3 + $0x8] sm:$0xff]  }
   0x7   :  { %562 = vmatpush3.bf16.msra.mxu0 %v634_v1  ;;  %v651_v19 = vld [vmem:[%s881_s3 + $0x10] sm:$0xff]   ;;  %v652_v20 = vld [vmem:[%s881_s3 + $0x18] sm:$0xff]   ;;  %v653_v21 = vld [vmem:[%s881_s3 + $0x20] sm:$0xff]  }
   0x8   :  { %563 = vmatprep.subr.bf16.mxu0 %v635_v2  ;;  %v654_v22 = vld [vmem:[%s881_s3 + $0x28] sm:$0xff]   ;;  %v655_v23 = vld [vmem:[%s881_s3 + $0x30] sm:$0xff]   ;;  %v793_v25 = vld [vmem:[%s882_s2] ss:$0 sm:$0xff] }
   0xb   :  { %564 = vmatpush3.bf16.msra.mxu0 %v635_v2 }
   0xc   :  { %565 = vmatprep.subr.bf16.mxu0 %v636_v3 }
   0xf   :  { %566 = vmatpush3.bf16.msra.mxu0 %v636_v3 }
  0x10   :  { %567 = vmatprep.subr.bf16.mxu0 %v637_v5 }
  0x13   :  { %568 = vmatpush3.bf16.msra.mxu0 %v637_v5 }
  0x14   :  { %569 = vmatprep.subr.bf16.mxu0 %v638_v6 }
  0x17   :  { %570 = vmatpush3.bf16.msra.mxu0 %v638_v6 }
  0x18   :  { %571 = vmatprep.subr.bf16.mxu0 %v639_v7 }
  0x1b   :  { %572 = vmatpush3.bf16.msra.mxu0 %v639_v7 }
  0x1c   :  { %573 = vmatprep.subr.bf16.mxu0 %v640_v8 }
  0x1f   :  { %574 = vmatpush3.bf16.msra.mxu0 %v640_v8 }
  0x20   :  { %611 = vmatprep.subr.bf16.mxu0 %v673_v16 }
  0x22   :  { %576 = vmatmul.mubr.bf16.vlgmr.msra.gmra.mrb[0].mxu0 %v642_v9 }
  0x23   :  { %579 = vmatprep.mubr.bf16.mxu0 %v643_v10  ;;  %612 = vmatpush3.bf16.msra.mxu0 %v649_v17 }
  0x24   :  { %613 = vmatprep.subr.bf16.mxu0 %v673_v16 }
  0x27   :  { %614 = vmatpush3.bf16.msra.mxu0 %v650_v18 }
  0x28   :  { %615 = vmatprep.subr.bf16.mxu0 %v673_v16 }
  0x2a   :  { %580 = vmatmul.mubr.bf16.gmra.mrb[4].mxu0 %v644_v11 }
  0x2b   :  { %583 = vmatprep.mubr.bf16.mxu0 %v645_v12  ;;  %616 = vmatpush3.bf16.msra.mxu0 %v651_v19 }
  0x2c   :  { %617 = vmatprep.subr.bf16.mxu0 %v673_v16 }
  0x2f   :  { %618 = vmatpush3.bf16.msra.mxu0 %v652_v20 }
  0x30   :  { %619 = vmatprep.subr.bf16.mxu0 %v673_v16 }
  0x32   :  { %584 = vmatmul.mubr.bf16.gmra.mrb[8].mxu0 %v646_v13 }
  0x33   :  { %587 = vmatprep.mubr.bf16.mxu0 %v647_v14  ;;  %620 = vmatpush3.bf16.msra.mxu0 %v653_v21 }
  0x34   :  { %621 = vmatprep.subr.bf16.mxu0 %v673_v16 }
  0x37   :  { %622 = vmatpush3.bf16.msra.mxu0 %v654_v22 }
  0x38   :  { %623 = vmatprep.subr.bf16.mxu0 %v673_v16 }
  0x3a   :  { %588 = vmatmul.mubr.bf16.gmra.mrb[12].mxu0 %v648_v15 }
  0x3b   :  { %627 = vmatprep.mubr.msk.bf16.mxu0 %vm674_vm0, %v673_v16  ;;  %624 = vmatpush3.bf16.msra.mxu0 %v655_v23 }
  0x3c   :  { %625 = vmatprep.subr.bf16.mxu0 %v673_v16 }
  0xf5   :  { %v577_v24 = vpop.f32.mrb[0].mxu0 }
  0xf6   :  { %v197_v26 = vpop.f32.mrb[1].mxu0  ;;  %v206_v28 = vadd.f32 %v577_v24, %v793_v25 }
  0xf7   :  { %v578_v27 = vpop.f32.mrb[2].mxu0  ;;  %v198_v31 = vadd.f32 %v793_v25, %v197_v26 }
  0xf8   :  { %v209_v29 = vadd.f32 %v578_v27, %v793_v25  ;;  %v200_v30 = vpop.f32.mrb[3].mxu0 }
  0xf9   :  { %v201_v32 = vadd.f32 %v793_v25, %v200_v30 }
  0xfa   :  { %v799_v33 = vpack.c.bf16 %v209_v29, %v206_v28 }
  0xfb   :  { %v801_v34 = vpack.c.bf16 %v201_v32, %v198_v31 }
  0xfc   :  { %v269_v35 = vmul.bf16 %v799_v33, %v799_v33 }
  0xfd   :  { %v268_v36 = vmul.bf16 %v801_v34, %v801_v34  ;;  %v581_v37 = vpop.f32.mrb[4].mxu0 }
  0xfe   :  { %v277_v38 = vmul.bf16 %v269_v35, %v799_v33  ;;  %v213_v39 = vpop.f32.mrb[5].mxu0  ;;  %v222_v43 = vadd.f32 %v581_v37, %v793_v25 }
  0xff   :  { %v582_v40 = vpop.f32.mrb[6].mxu0  ;;  %v276_v41 = vmul.bf16 %v268_v36, %v801_v34  ;;  %v214_v46 = vadd.f32 %v793_v25, %v213_v39 }
 0x100   :  { %v285_v42 = vmul.bf16 1027030327, %v277_v38  ;;  %v225_v44 = vadd.f32 %v582_v40, %v793_v25  ;;  %v216_v45 = vpop.f32.mrb[7].mxu0 }
 0x101   :  { %v217_v47 = vadd.f32 %v793_v25, %v216_v45  ;;  %v284_v48 = vmul.bf16 1027030327, %v276_v41 }
 0x102   :  { %v813_v49 = vpack.c.bf16 %v225_v44, %v222_v43  ;;  %v293_v50 = vadd.bf16 %v285_v42, %v799_v33 }
 0x103   :  { %v816_v51 = vpack.c.bf16 %v217_v47, %v214_v46  ;;  %v292_v52 = vadd.bf16 %v284_v48, %v801_v34 }
 0x104   :  { %v271_v53 = vmul.bf16 %v813_v49, %v813_v49  ;;  %v301_v54 = vmul.bf16 1061961548, %v293_v50 }
 0x105   :  { %v270_v55 = vmul.bf16 %v816_v51, %v816_v51  ;;  %v585_v56 = vpop.f32.mrb[8].mxu0  ;;  %v300_v57 = vmul.bf16 1061961548, %v292_v52 }
 0x106   :  { %v279_v58 = vmul.bf16 %v271_v53, %v813_v49  ;;  %v229_v59 = vpop.f32.mrb[9].mxu0  ;;  %657 = vtanh.bf16 %v301_v54  ;;  %v238_v63 = vadd.f32 %v585_v56, %v793_v25 }
 0x107   :  { %v278_v60 = vmul.bf16 %v270_v55, %v816_v51  ;;  %v586_v61 = vpop.f32.mrb[10].mxu0  ;;  %659 = vtanh.bf16 %v300_v57  ;;  %v230_v3 = vadd.f32 %v793_v25, %v229_v59 }
 0x108   :  { %v287_v62 = vmul.bf16 1027030327, %v279_v58  ;;  %v241_v0 = vadd.f32 %v586_v61, %v793_v25  ;;  %v232_v1 = vpop.f32.mrb[11].mxu0 }
 0x109   :  { %v286_v2 = vmul.bf16 1027030327, %v278_v60  ;;  %v233_v4 = vadd.f32 %v793_v25, %v232_v1 }
 0x10a   :  { %v829_v5 = vpack.c.bf16 %v241_v0, %v238_v63  ;;  %v295_v6 = vadd.bf16 %v287_v62, %v813_v49 }
 0x10b   :  { %v832_v7 = vpack.c.bf16 %v233_v4, %v230_v3  ;;  %v294_v8 = vadd.bf16 %v286_v2, %v816_v51 }
 0x10c   :  { %v273_v9 = vmul.bf16 %v829_v5, %v829_v5  ;;  %v303_v10 = vmul.bf16 1061961548, %v295_v6 }
 0x10d   :  { %v272_v11 = vmul.bf16 %v832_v7, %v832_v7  ;;  %v589_v12 = vpop.f32.mrb[12].mxu0  ;;  %v302_v13 = vmul.bf16 1061961548, %v294_v8 }
 0x10e   :  { %v281_v14 = vmul.bf16 %v273_v9, %v829_v5  ;;  %v245_v15 = vpop.f32.mrb[13].mxu0  ;;  %661 = vtanh.bf16 %v303_v10  ;;  %v254_v20 = vadd.f32 %v589_v12, %v793_v25 }
 0x10f   :  { %v280_v17 = vmul.bf16 %v272_v11, %v832_v7  ;;  %v590_v18 = vpop.f32.mrb[14].mxu0  ;;  %663 = vtanh.bf16 %v302_v13  ;;  %v246_v26 = vadd.f32 %v793_v25, %v245_v15  ;;  %v340_v11 = vld [vmem:[%s883_s5] sm:$0xf] }
 0x110   :  { %v289_v19 = vmul.bf16 1027030327, %v281_v14  ;;  %v257_v21 = vadd.f32 %v590_v18, %v793_v25  ;;  %v248_v22 = vpop.f32.mrb[15].mxu0 }
 0x111   :  { %v658_v23 = vpop.eup %657  ;;  %v288_v24 = vmul.bf16 1027030327, %v280_v17  ;;  %v249_v27 = vadd.f32 %v793_v25, %v248_v22 }
 0x112   :  { %v660_v28 = vpop.eup %659  ;;  %v845_v29 = vpack.c.bf16 %v257_v21, %v254_v20  ;;  %v297_v30 = vadd.bf16 %v289_v19, %v829_v5  ;;  %v317_v35 = vadd.bf16 1065369472, %v658_v23 }
 0x113   :  { %v266_v31 = vpack.c.bf16 %v249_v27, %v246_v26  ;;  %v316_v32 = vadd.bf16 1065369472, %v660_v28  ;;  %v296_v36 = vadd.bf16 %v288_v24, %v832_v7 }
 0x114   :  { %v275_v37 = vmul.bf16 %v845_v29, %v845_v29  ;;  %v305_v38 = vmul.bf16 1061961548, %v297_v30  ;;  %v325_v44 = vmul.bf16 1056980736, %v317_v35 }
 0x115   :  { %v274_v39 = vmul.bf16 %v266_v31, %v266_v31  ;;  %v324_v40 = vmul.bf16 1056980736, %v316_v32  ;;  %v304_v41 = vmul.bf16 1061961548, %v296_v36 }
 0x116   :  { %v283_v42 = vmul.bf16 %v275_v37, %v845_v29  ;;  %665 = vtanh.bf16 %v305_v38  ;;  %v333_v52 = vmul.bf16 %v325_v44, %v799_v33 }
 0x117   :  { %v282_v25 = vmul.bf16 %v274_v39, %v266_v31  ;;  %v332_v43 = vmul.bf16 %v324_v40, %v801_v34  ;;  %667 = vtanh.bf16 %v304_v41 }
 0x118   :  { %v291_v45 = vmul.bf16 1027030327, %v283_v42 }
 0x119   :  { %v662_v46 = vpop.eup %661  ;;  %v290_v47 = vmul.bf16 1027030327, %v282_v25  ;;  %592 = vmatpush3.bf16.msra.mxu1 %v332_v43 }
 0x11a   :  { %v664_v48 = vpop.eup %663  ;;  %593 = vmatprep.subr.bf16.mxu1 %v673_v16  ;;  %v299_v50 = vadd.bf16 %v291_v45, %v845_v29  ;;  %v319_v54 = vadd.bf16 1065369472, %v662_v46 }
 0x11b   :  { %v318_v53 = vadd.bf16 1065369472, %v664_v48  ;;  %v298_v55 = vadd.bf16 %v290_v47, %v266_v31 }
 0x11c   :  { %v307_v56 = vmul.bf16 1061961548, %v299_v50  ;;  %v327_v59 = vmul.bf16 1056980736, %v319_v54 }
 0x11d   :  { %594 = vmatpush3.bf16.msra.mxu1 %v333_v52  ;;  %v326_v57 = vmul.bf16 1056980736, %v318_v53  ;;  %v306_v34 = vmul.bf16 1061961548, %v298_v55 }
 0x11e   :  { %595 = vmatprep.subr.bf16.mxu1 %v673_v16  ;;  %669 = vtanh.bf16 %v307_v56  ;;  %v335_v33 = vmul.bf16 %v327_v59, %v813_v49 }
 0x11f   :  { %v334_v58 = vmul.bf16 %v326_v57, %v816_v51  ;;  %671 = vtanh.bf16 %v306_v34 }
 0x121   :  { %v666_v60 = vpop.eup %665  ;;  %596 = vmatpush3.bf16.msra.mxu1 %v334_v58 }
 0x122   :  { %v668_v61 = vpop.eup %667  ;;  %597 = vmatprep.subr.bf16.mxu1 %v673_v16  ;;  %v321_v63 = vadd.bf16 1065369472, %v666_v60 }
 0x123   :  { %v320_v62 = vadd.bf16 1065369472, %v668_v61 }
 0x124   :  { %v329_v2 = vmul.bf16 1056980736, %v321_v63 }
 0x125   :  { %598 = vmatpush3.bf16.msra.mxu1 %v335_v33  ;;  %v328_v0 = vmul.bf16 1056980736, %v320_v62 }
 0x126   :  { %599 = vmatprep.subr.bf16.mxu1 %v673_v16  ;;  %v337_v4 = vmul.bf16 %v329_v2, %v829_v5  ;;  %v656_v5 = vld [vmem:[%s881_s3 + $0x38] sm:$0xff]  }
 0x127   :  { %v336_v1 = vmul.bf16 %v328_v0, %v832_v7  ;;  %626 = vmatpush3.bf16.msra.mxu0 %v656_v5 }
 0x129   :  { %v670_v3 = vpop.eup %669  ;;  %600 = vmatpush3.bf16.msra.mxu1 %v336_v1 }
 0x12a   :  { %v672_v51 = vpop.eup %671  ;;  %601 = vmatprep.subr.bf16.mxu1 %v673_v16  ;;  %v323_v8 = vadd.bf16 1065369472, %v670_v3 }
 0x12b   :  { %v322_v6 = vadd.bf16 1065369472, %v672_v51 }
 0x12c   :  { %v331_v10 = vmul.bf16 1056980736, %v323_v8 }
 0x12d   :  { %602 = vmatpush3.bf16.msra.mxu1 %v337_v4  ;;  %v330_v49 = vmul.bf16 1056980736, %v322_v6 }
 0x12e   :  { %603 = vmatprep.subr.bf16.mxu1 %v673_v16  ;;  %v339_v7 = vmul.bf16 %v331_v10, %v845_v29 }
 0x12f   :  { %v338_v9 = vmul.bf16 %v330_v49, %v266_v31 }
 0x131   :  { %604 = vmatpush3.bf16.msra.mxu1 %v338_v9 }
 0x132   :  { %605 = vmatprep.subr.bf16.mxu1 %v673_v16  ;;  %v516_v16 = vld [vmem:[%s884_s4] ss:$0 sm:$0xff] }
 0x135   :  { %606 = vmatpush3.bf16.msra.mxu1 %v339_v7 }
 0x138   :  { %608 = vmatmul.mubr.bf16.vlgmr.msra.gmra.mrb[0].mxu1 %v340_v11 }
 0x20b   :  { %v375_v12 = vpop.f32.mrb[0].mxu1 }
 0x20c   :  { %v381_v13 = vmul.f32 0.0625, %v375_v12  ;;  %v609_v14 = vpop.f32.mrb[1].mxu1 }
 0x20d   :  { %v378_v15 = vpop.f32.mrb[2].mxu1 }
 0x20e   :  { %v382_v17 = vpack.c.bf16 %v381_v13, %v381_v13  ;;  %v610_v18 = vpop.f32.mrb[3].mxu1 }
 0x210   :  { %628 = vmatmul.mubr.bf16.vlgmr.msra.gmra.mrb[16].mxu0 %v382_v17 }
 0x2e3   :  { %v488_v19 = vpop.f32.mrb[16].mxu0 }
 0x2e4   :  { %v489_v20 = vadd.f32 %v516_v16, %v488_v19  ;;  %v629_v21 = vpop.f32.mrb[17].mxu0 }
 0x2e5   :  { %v491_v22 = vpop.f32.mrb[18].mxu0 }
 0x2e6   :  { %494 = vst [vmem:[%s885_s6] sm:$0xff] %v489_v20  ;;  %v630_v23 = vpop.f32.mrb[19].mxu0 }

</bundles_post_ra>
